<compile_context>
chip_gen: v6e
topology: v6e:2x2x1
jax: 0.10.0
libtpu: 0.0.40
codegen_flags: <defaults>
</compile_context>

<pallas_src>
import numpy as np
import jax
import jax.numpy as jnp
from jax.experimental import pallas as pl
from jax.experimental.pallas import tpu as pltpu

H_CHANNELS = [5, 7, 10, 14]        # CNNModel.h
KSIZE, STRIDE, PAD = 3, 2, 1       # get_cnn_layer(..., 3, 1, 2, ...) -> Conv2d(k=3, stride=2, pad=1)


# ---------------------------------------------------------------------------
# Fused kernel: (pre-folded conv stack + pool) GEMM -> 3-layer MLP head.
# ---------------------------------------------------------------------------
def _cnn_fused_kernel(x_ref, wc_ref, bc_ref,
                      wf1_ref, bf1_ref, wf2_ref, bf2_ref, wf3_ref, bf3_ref,
                      o_ref):
    # Folded conv1->conv4->AdaptiveAvgPool2d(1): one [B, 1024] @ [1024, 14] MXU GEMM.
    feat = jnp.dot(x_ref[...], wc_ref[...],
                   preferred_element_type=jnp.float32) + bc_ref[...]
    # MLP head: Linear(14,20)+ReLU -> Linear(20,10)+ReLU -> Linear(10,1)
    h = jnp.dot(feat, wf1_ref[...], preferred_element_type=jnp.float32) + bf1_ref[...]
    h = jnp.maximum(h, 0.0)
    h = jnp.dot(h, wf2_ref[...], preferred_element_type=jnp.float32) + bf2_ref[...]
    h = jnp.maximum(h, 0.0)
    # Final layer has a single output feature: multiply + lane reduction (no N=1 matmul).
    out = jnp.sum(h * wf3_ref[...], axis=-1, keepdims=True) + bf3_ref[...]
    o_ref[...] = out.astype(o_ref.dtype)


def cnn_forward_pallas(x, folded):
    """Forward pass.  `folded` comes from fold_params() (one-time weight prep)."""
    B = x.shape[0]
    x_flat = x.reshape(B, -1)   # NCHW flatten -> [B, C*H*W]; matches the fold's basis order

    inputs = [x_flat,
              folded["w_comb"], folded["b_comb"],
              folded["wf1"], folded["bf1"],
              folded["wf2"], folded["bf2"],
              folded["wf3"], folded["bf3"]]

    # Total VMEM (lane-padded): ~0.6 MiB -> no grid needed at these sizes.  For large B,
    # tile x_flat / output over a batch grid with dimension_semantics=("parallel",).
    return pl.pallas_call(
        _cnn_fused_kernel,
        out_shape=jax.ShapeDtypeStruct((B, 1), x.dtype),
        in_specs=[pl.BlockSpec(memory_space=pltpu.VMEM) for _ in inputs],
        out_specs=pl.BlockSpec(memory_space=pltpu.VMEM),
    )(*inputs)


# ---------------------------------------------------------------------------
# One-time, input-independent weight preparation (hoisted out of the forward path).
# ---------------------------------------------------------------------------
def fold_params(params, img_channels, img_size):
    """Fold conv1..conv4 + bias adds + AdaptiveAvgPool2d(1) into feat = x_flat @ W + b.

    The conv stack has no nonlinearity, so it is affine in the input.  The exact affine map
    is obtained by pushing the identity basis (and the zero input, for the bias term) through
    the conv chain at HIGHEST precision.  This runs once per set of weights.
    """
    hp = jax.lax.Precision.HIGHEST

    def conv_stack(v):                                   # [N, C, H, W] -> [N, C_last] (affine)
        h = v
        for (w, b) in params["convs"]:
            h = jax.lax.conv_general_dilated(
                h, w, window_strides=(STRIDE, STRIDE),
                padding=((PAD, PAD), (PAD, PAD)),
                dimension_numbers=("NCHW", "OIHW", "NCHW"),
                precision=hp)
            h = h + b[None, :, None, None]
        return jnp.mean(h, axis=(2, 3))                  # AdaptiveAvgPool2d(1) + flatten

    n_in = img_channels * img_size * img_size
    basis = jnp.eye(n_in, dtype=jnp.float32).reshape(n_in, img_channels, img_size, img_size)
    b_comb = conv_stack(jnp.zeros((1, img_channels, img_size, img_size), jnp.float32))  # [1, 14]
    w_comb = conv_stack(basis) - b_comb                                                 # [1024, 14]

    (wf1, bf1), (wf2, bf2), (wf3, bf3) = params["fc"]    # PyTorch layout: [out, in]
    return {
        "w_comb": w_comb, "b_comb": b_comb,
        "wf1": jnp.transpose(wf1), "bf1": bf1.reshape(1, -1),
        "wf2": jnp.transpose(wf2), "bf2": bf2.reshape(1, -1),
        "wf3": wf3.reshape(1, -1),  "bf3": bf3.reshape(1, -1),   # last layer kept as [1, in]
    }


# ---------------------------------------------------------------------------
# Parameter init (mimics nn.Conv2d / nn.Linear default U(+-1/sqrt(fan_in))).
# ---------------------------------------------------------------------------
def init_cnn_params(img_channels, key):
    params = {"convs": [], "fc": []}
    c_in = img_channels
    for c_out in H_CHANNELS:
        key, kw, kb = jax.random.split(key, 3)
        bound = 1.0 / np.sqrt(c_in * KSIZE * KSIZE)
        w = jax.random.uniform(kw, (c_out, c_in, KSIZE, KSIZE), jnp.float32, -bound, bound)
        b = jax.random.uniform(kb, (c_out,), jnp.float32, -bound, bound)
        params["convs"].append((w, b))
        c_in = c_out
    for (d_in, d_out) in [(H_CHANNELS[-1], 20), (20, 10), (10, 1)]:
        key, kw, kb = jax.random.split(key, 3)
        bound = 1.0 / np.sqrt(d_in)
        w = jax.random.uniform(kw, (d_out, d_in), jnp.float32, -bound, bound)   # PyTorch [out, in]
        b = jax.random.uniform(kb, (d_out,), jnp.float32, -bound, bound)
        params["fc"].append((w, b))
    return params


# ---------------------------------------------------------------------------
# Plain-JAX reference (layer-by-layer, unfolded) for correctness checking.
# ---------------------------------------------------------------------------
def reference_forward(x, params):
    hp = jax.lax.Precision.HIGHEST
    h = x
    for (w, b) in params["convs"]:
        h = jax.lax.conv_general_dilated(
            h, w, window_strides=(STRIDE, STRIDE),
            padding=((PAD, PAD), (PAD, PAD)),
            dimension_numbers=("NCHW", "OIHW", "NCHW"),
            precision=hp)
        h = h + b[None, :, None, None]
    h = jnp.mean(h, axis=(2, 3))                         # AdaptiveAvgPool2d(1) + flatten
    (w1, b1), (w2, b2), (w3, b3) = params["fc"]
    h = jnp.maximum(jnp.dot(h, w1.T, precision=hp) + b1, 0.0)
    h = jnp.maximum(jnp.dot(h, w2.T, precision=hp) + b2, 0.0)
    return jnp.dot(h, w3.T, precision=hp) + b3


if __name__ == "__main__":
    B, C, IMG = 2, 4, 16
    key = jax.random.PRNGKey(0)
    key, kx = jax.random.split(key)
    x = jax.random.normal(kx, (B, C, IMG, IMG), jnp.float32)

    params = init_cnn_params(C, key)
    folded = fold_params(params, C, IMG)                 # one-time weight prep (not per call)

    out = cnn_forward_pallas(x, folded)
    out = jax.block_until_ready(out)

    ref = reference_forward(x, params)
    assert out.shape == (B, 1), out.shape
    assert jnp.allclose(out, ref, atol=1e-3, rtol=1e-3), (out, ref)
    print("KERNEL_OK")
</pallas_src>

<mosaic_0001>
module attributes {stable_mosaic.version = 11 : i64} {
  func.func @_cnn_fused_kernel(%arg0: memref<2x1024xf32, #tpu.memory_space<vmem>>, %arg1: memref<1024x14xf32, #tpu.memory_space<vmem>>, %arg2: memref<1x14xf32, #tpu.memory_space<vmem>>, %arg3: memref<14x20xf32, #tpu.memory_space<vmem>>, %arg4: memref<1x20xf32, #tpu.memory_space<vmem>>, %arg5: memref<20x10xf32, #tpu.memory_space<vmem>>, %arg6: memref<1x10xf32, #tpu.memory_space<vmem>>, %arg7: memref<1x10xf32, #tpu.memory_space<vmem>>, %arg8: memref<1x1xf32, #tpu.memory_space<vmem>>, %arg9: memref<2x1xf32, #tpu.memory_space<vmem>>) attributes {dimension_semantics = [], scalar_prefetch = 0 : i64, scratch_operands = 0 : i64, tpu.core_type = #tpu.core_type<tc>} {
    %c0 = arith.constant 0 : index
    %c0_0 = arith.constant 0 : index
    %0 = vector.load %arg0[%c0, %c0_0] : memref<2x1024xf32, #tpu.memory_space<vmem>>, vector<2x1024xf32>
    %c0_1 = arith.constant 0 : index
    %c0_2 = arith.constant 0 : index
    %1 = vector.load %arg1[%c0_1, %c0_2] : memref<1024x14xf32, #tpu.memory_space<vmem>>, vector<1024x14xf32>
    %cst = arith.constant dense<0.000000e+00> : vector<2x14xf32>
    %2 = tpu.matmul %0, %1, %cst {dimension_numbers = #tpu.dot_dimension_numbers<[1], [0], [0], [1], [0, 0, 1, 1], [], []>} : vector<2x1024xf32>, vector<1024x14xf32>, vector<2x14xf32> -> vector<2x14xf32>
    %c0_3 = arith.constant 0 : index
    %c0_4 = arith.constant 0 : index
    %3 = vector.load %arg2[%c0_3, %c0_4] : memref<1x14xf32, #tpu.memory_space<vmem>>, vector<1x14xf32>
    %4 = vector.broadcast %3 : vector<1x14xf32> to vector<2x14xf32>
    %5 = arith.addf %2, %4 : vector<2x14xf32>
    %c0_5 = arith.constant 0 : index
    %c0_6 = arith.constant 0 : index
    %6 = vector.load %arg3[%c0_5, %c0_6] : memref<14x20xf32, #tpu.memory_space<vmem>>, vector<14x20xf32>
    %cst_7 = arith.constant dense<0.000000e+00> : vector<2x20xf32>
    %7 = tpu.matmul %5, %6, %cst_7 {dimension_numbers = #tpu.dot_dimension_numbers<[1], [0], [0], [1], [0, 0, 1, 1], [], []>} : vector<2x14xf32>, vector<14x20xf32>, vector<2x20xf32> -> vector<2x20xf32>
    %c0_8 = arith.constant 0 : index
    %c0_9 = arith.constant 0 : index
    %8 = vector.load %arg4[%c0_8, %c0_9] : memref<1x20xf32, #tpu.memory_space<vmem>>, vector<1x20xf32>
    %9 = vector.broadcast %8 : vector<1x20xf32> to vector<2x20xf32>
    %10 = arith.addf %7, %9 : vector<2x20xf32>
    %cst_10 = arith.constant 0.000000e+00 : f32
    %11 = vector.broadcast %cst_10 : f32 to vector<2x20xf32>
    %12 = arith.maximumf %10, %11 : vector<2x20xf32>
    %c0_11 = arith.constant 0 : index
    %c0_12 = arith.constant 0 : index
    %13 = vector.load %arg5[%c0_11, %c0_12] : memref<20x10xf32, #tpu.memory_space<vmem>>, vector<20x10xf32>
    %cst_13 = arith.constant dense<0.000000e+00> : vector<2x10xf32>
    %14 = tpu.matmul %12, %13, %cst_13 {dimension_numbers = #tpu.dot_dimension_numbers<[1], [0], [0], [1], [0, 0, 1, 1], [], []>} : vector<2x20xf32>, vector<20x10xf32>, vector<2x10xf32> -> vector<2x10xf32>
    %c0_14 = arith.constant 0 : index
    %c0_15 = arith.constant 0 : index
    %15 = vector.load %arg6[%c0_14, %c0_15] : memref<1x10xf32, #tpu.memory_space<vmem>>, vector<1x10xf32>
    %16 = vector.broadcast %15 : vector<1x10xf32> to vector<2x10xf32>
    %17 = arith.addf %14, %16 : vector<2x10xf32>
    %cst_16 = arith.constant 0.000000e+00 : f32
    %18 = vector.broadcast %cst_16 : f32 to vector<2x10xf32>
    %19 = arith.maximumf %17, %18 : vector<2x10xf32>
    %c0_17 = arith.constant 0 : index
    %c0_18 = arith.constant 0 : index
    %20 = vector.load %arg7[%c0_17, %c0_18] : memref<1x10xf32, #tpu.memory_space<vmem>>, vector<1x10xf32>
    %21 = vector.broadcast %20 : vector<1x10xf32> to vector<2x10xf32>
    %22 = arith.mulf %19, %21 : vector<2x10xf32>
    %cst_19 = arith.constant dense<0.000000e+00> : vector<2xf32>
    %23 = vector.multi_reduction <add>, %22, %cst_19 [1] : vector<2x10xf32> to vector<2xf32>
    %24 = vector.shape_cast %23 : vector<2xf32> to vector<2x1xf32>
    %c0_20 = arith.constant 0 : index
    %c0_21 = arith.constant 0 : index
    %25 = vector.load %arg8[%c0_20, %c0_21] : memref<1x1xf32, #tpu.memory_space<vmem>>, vector<1x1xf32>
    %26 = vector.broadcast %25 : vector<1x1xf32> to vector<2x1xf32>
    %27 = arith.addf %24, %26 : vector<2x1xf32>
    %c0_22 = arith.constant 0 : index
    %c0_23 = arith.constant 0 : index
    %28 = vector.load %arg9[%c0_22, %c0_23] : memref<2x1xf32, #tpu.memory_space<vmem>>, vector<2x1xf32>
    tpu.vector_store %arg9[%c0_22, %c0_23], %27 {strides = array<i32>} : memref<2x1xf32, #tpu.memory_space<vmem>>, vector<2x1xf32>,
    return
  }
}

</mosaic_0001>

<bundles_post_ra>
// kernel: tpu_custom_call.1
= control target key start
LH: loop header
LB: loop body
LE: loop exit
PB: predicated region body
PF: predicated region fallthrough
CT: control target
= control target key end

     0   :  { %v875_v30 = vmov 1983009808   ;;  %v177_v32 = vlaneseq  ;;  %vm508_vm0 = vcmask 1045504   ;;  %vm877_vm1 = vmmov 0   ;;  %s1357_s1 = inlined_call_operand.vmem [shape: f32[1024,14], index: 1, kind: input, shape index: {}]   ;;  %s1358_s0 = inlined_call_operand.vmem [shape: f32[2,1024], index: 0, kind: input, shape index: {}]   ;;  %s1359_s3 = inlined_call_operand.vmem [shape: f32[14,20], index: 3, kind: input, shape index: {}]   ;;  %s1360_s2 = inlined_call_operand.vmem [shape: f32[1,14], index: 2, kind: input, shape index: {}]   ;;  %s1361_s5 = inlined_call_operand.vmem [shape: f32[20,10], index: 5, kind: input, shape index: {}]   ;;  %s1362_s4 = inlined_call_operand.vmem [shape: f32[1,20], index: 4, kind: input, shape index: {}]   ;;  %s1363_s8 = inlined_call_operand.<no memory space> [shape: f32[1,1], index: 8, kind: input, shape index: {}]   ;;  %s1364_s6 = inlined_call_operand.vmem [shape: f32[1,10], index: 6, kind: input, shape index: {}]   ;;  %s1365_s7 = inlined_call_operand.vmem [shape: f32[1,10], index: 7, kind: input, shape index: {}]   ;;  %s1366_s9 = inlined_call_operand.vmem [shape: f32[2,1], index: 9, kind: output, shape index: {}]  }
   0x1   :  { %v67_v0 = vld [vmem:[%s1357_s1 + $0xf8] sm:$0xff]  ;;  %v66_v4 = vld [vmem:[%s1357_s1 + $0xf0] sm:$0xff]  ;;  %v65_v8 = vld [vmem:[%s1357_s1 + $0xe8] sm:$0xff]  ;;  %v175_v31 = vunpack.c.l.s4 %v875_v30  ;;  %vm504_vm2 = vcmask 113664   ;;  %vm597_vm3 = vcmask 1043456   ;;  %vm593_vm4 = vcmask 162816  }
   0x2   :  { %v99_v1 = vld [vmem:[%s1357_s1 + $0x1f8] sm:$0xff]  ;;  %707 = vmatprep.subr.mxu0 %v67_v0  ;;  %v98_v5 = vld [vmem:[%s1357_s1 + $0x1f0] sm:$0xff]  ;;  %v97_v9 = vld [vmem:[%s1357_s1 + $0x1e8] sm:$0xff]  ;;  %v178_v42 = vshrl.u32 %v177_v32, 7  ;;  %vm680_vm5 = vcmask 74752   ;;  %vm692_vm6 = vcmask 1024  }
   0x3   :  { %v51_v2 = vld [vmem:[%s1357_s1 + $0x78] sm:$0xff]  ;;  %742 = vmatprep.subr.mxu1 %v99_v1  ;;  %v50_v6 = vld [vmem:[%s1357_s1 + $0x70] sm:$0xff]  ;;  %v49_v10 = vld [vmem:[%s1357_s1 + $0x68] sm:$0xff]  ;;  %v176_v41 = vunpack.c.0.s8 %v175_v31 }
   0x4   :  { %v83_v3 = vld [vmem:[%s1357_s1 + $0x178] sm:$0xff]  ;;  %708 = vmatpush3.msra.mxu0 %v51_v2  ;;  %v82_v7 = vld [vmem:[%s1357_s1 + $0x170] sm:$0xff]  ;;  %v81_v11 = vld [vmem:[%s1357_s1 + $0x168] sm:$0xff] }
   0x5   :  { %743 = vmatpush3.msra.mxu1 %v83_v3  ;;  %709 = vmatprep.subr.mxu0 %v66_v4  ;;  %v64_v12 = vld [vmem:[%s1357_s1 + $0xe0] sm:$0xff]  ;;  %v63_v16 = vld [vmem:[%s1357_s1 + $0xd8] sm:$0xff]  ;;  %v62_v20 = vld [vmem:[%s1357_s1 + $0xd0] sm:$0xff]  ;;  %v1066_v51 = vsub.s32 %v176_v41, %v178_v42 }
   0x6   :  { %744 = vmatprep.subr.mxu1 %v98_v5  ;;  %710 = vmatpush3.msra.mxu0 %v50_v6  ;;  %v96_v13 = vld [vmem:[%s1357_s1 + $0x1e0] sm:$0xff]  ;;  %v95_v17 = vld [vmem:[%s1357_s1 + $0x1d8] sm:$0xff]  ;;  %v94_v21 = vld [vmem:[%s1357_s1 + $0x1d0] sm:$0xff] }
   0x7   :  { %745 = vmatpush3.msra.mxu1 %v82_v7  ;;  %711 = vmatprep.subr.mxu0 %v65_v8  ;;  %v48_v14 = vld [vmem:[%s1357_s1 + $0x60] sm:$0xff]  ;;  %v47_v18 = vld [vmem:[%s1357_s1 + $0x58] sm:$0xff]  ;;  %v46_v22 = vld [vmem:[%s1357_s1 + $0x50] sm:$0xff] }
   0x8   :  { %746 = vmatprep.subr.mxu1 %v97_v9  ;;  %v80_v15 = vld [vmem:[%s1357_s1 + $0x160] sm:$0xff]  ;;  %712 = vmatpush3.msra.mxu0 %v49_v10  ;;  %v79_v19 = vld [vmem:[%s1357_s1 + $0x158] sm:$0xff]  ;;  %v78_v23 = vld [vmem:[%s1357_s1 + $0x150] sm:$0xff] }
   0x9   :  { %747 = vmatpush3.msra.mxu1 %v81_v11  ;;  %713 = vmatprep.subr.mxu0 %v64_v12  ;;  %v61_v24 = vld [vmem:[%s1357_s1 + $0xc8] sm:$0xff]  ;;  %v60_v28 = vld [vmem:[%s1357_s1 + $0xc0] sm:$0xff]  ;;  %v59_v35 = vld [vmem:[%s1357_s1 + $0xb8] sm:$0xff] }
   0xa   :  { %748 = vmatprep.subr.mxu1 %v96_v13  ;;  %714 = vmatpush3.msra.mxu0 %v48_v14  ;;  %v93_v25 = vld [vmem:[%s1357_s1 + $0x1c8] sm:$0xff]  ;;  %v92_v29 = vld [vmem:[%s1357_s1 + $0x1c0] sm:$0xff]  ;;  %v91_v36 = vld [vmem:[%s1357_s1 + $0x1b8] sm:$0xff] }
   0xb   :  { %749 = vmatpush3.msra.mxu1 %v80_v15  ;;  %715 = vmatprep.subr.mxu0 %v63_v16  ;;  %v45_v26 = vld [vmem:[%s1357_s1 + $0x48] sm:$0xff]  ;;  %v44_v33 = vld [vmem:[%s1357_s1 + $0x40] sm:$0xff]  ;;  %v43_v37 = vld [vmem:[%s1357_s1 + $0x38] sm:$0xff] }
   0xc   :  { %750 = vmatprep.subr.mxu1 %v95_v17  ;;  %716 = vmatpush3.msra.mxu0 %v47_v18  ;;  %v77_v27 = vld [vmem:[%s1357_s1 + $0x148] sm:$0xff]  ;;  %v76_v34 = vld [vmem:[%s1357_s1 + $0x140] sm:$0xff]  ;;  %v75_v38 = vld [vmem:[%s1357_s1 + $0x138] sm:$0xff] }
   0xd   :  { %751 = vmatpush3.msra.mxu1 %v79_v19  ;;  %717 = vmatprep.subr.mxu0 %v62_v20  ;;  %v58_v39 = vld [vmem:[%s1357_s1 + $0xb0] sm:$0xff]  ;;  %v57_v45 = vld [vmem:[%s1357_s1 + $0xa8] sm:$0xff]  ;;  %v56_v49 = vld [vmem:[%s1357_s1 + $0xa0] sm:$0xff] }
   0xe   :  { %752 = vmatprep.subr.mxu1 %v94_v21  ;;  %718 = vmatpush3.msra.mxu0 %v46_v22  ;;  %v90_v40 = vld [vmem:[%s1357_s1 + $0x1b0] sm:$0xff]  ;;  %v89_v46 = vld [vmem:[%s1357_s1 + $0x1a8] sm:$0xff]  ;;  %v88_v50 = vld [vmem:[%s1357_s1 + $0x1a0] sm:$0xff] }
   0xf   :  { %753 = vmatpush3.msra.mxu1 %v78_v23  ;;  %719 = vmatprep.subr.mxu0 %v61_v24  ;;  %v42_v43 = vld [vmem:[%s1357_s1 + $0x30] sm:$0xff]  ;;  %v41_v47 = vld [vmem:[%s1357_s1 + $0x28] sm:$0xff]  ;;  %v40_v52 = vld [vmem:[%s1357_s1 + $0x20] sm:$0xff] }
  0x10   :  { %754 = vmatprep.subr.mxu1 %v93_v25  ;;  %720 = vmatpush3.msra.mxu0 %v45_v26  ;;  %v74_v44 = vld [vmem:[%s1357_s1 + $0x130] sm:$0xff]  ;;  %v73_v48 = vld [vmem:[%s1357_s1 + $0x128] sm:$0xff]  ;;  %v72_v53 = vld [vmem:[%s1357_s1 + $0x120] sm:$0xff] }
  0x11   :  { %755 = vmatpush3.msra.mxu1 %v77_v27  ;;  %721 = vmatprep.subr.mxu0 %v60_v28  ;;  %v34_v54 = vld [vmem:[%s1358_s0] sm:$0xff]  ;;  %v55_v55 = vld [vmem:[%s1357_s1 + $0x98] sm:$0xff]  ;;  %v54_v60 = vld [vmem:[%s1357_s1 + $0x90] sm:$0xff] }
  0x12   :  { %756 = vmatprep.subr.mxu1 %v92_v29  ;;  %722 = vmatpush3.msra.mxu0 %v44_v33  ;;  %v87_v56 = vld [vmem:[%s1357_s1 + $0x198] sm:$0xff]  ;;  %v173_v57 = vcombine.high %v34_v54, %v34_v54  ;;  %v86_v61 = vld [vmem:[%s1357_s1 + $0x190] sm:$0xff]  ;;  %v180_v62 = vrot.slane %v34_v54, %v1066_v51  ;;  %v53_v1 = vld [vmem:[%s1357_s1 + $0x88] sm:$0xff] }
  0x13   :  { %757 = vmatpush3.msra.mxu1 %v76_v34  ;;  %723 = vmatprep.subr.mxu0 %v59_v35  ;;  %v39_v58 = vld [vmem:[%s1357_s1 + $0x18] sm:$0xff]  ;;  %v38_v63 = vld [vmem:[%s1357_s1 + $0x10] sm:$0xff]  ;;  %v85_v2 = vld [vmem:[%s1357_s1 + $0x188] sm:$0xff] }
  0x14   :  { %758 = vmatprep.subr.mxu1 %v91_v36  ;;  %724 = vmatpush3.msra.mxu0 %v43_v37  ;;  %v71_v59 = vld [vmem:[%s1357_s1 + $0x118] sm:$0xff]  ;;  %v70_v0 = vld [vmem:[%s1357_s1 + $0x110] sm:$0xff]  ;;  %v187_v3 = vrot.slane %v173_v57, %v1066_v51  ;;  %v37_v4 = vld [vmem:[%s1357_s1 + $0x8] sm:$0xff]  ;;  %v188_v8 = vcombine.high %v180_v62, %v180_v62 }
  0x15   :  { %759 = vmatpush3.msra.mxu1 %v75_v38  ;;  %725 = vmatprep.subr.mxu0 %v58_v39  ;;  %v69_v5 = vld [vmem:[%s1357_s1 + $0x108] sm:$0xff]  ;;  %v52_v6 = vld [vmem:[%s1357_s1 + $0x80] sm:$0xff]  ;;  %v131_v12 = vld [vmem:[%s1357_s1 + $0x2f8] sm:$0xff] }
  0x16   :  { %760 = vmatprep.subr.mxu1 %v90_v40  ;;  %726 = vmatpush3.msra.mxu0 %v42_v43  ;;  %v84_v7 = vld [vmem:[%s1357_s1 + $0x180] sm:$0xff]  ;;  %v189_v11 = vcombine.high %v187_v3, %v187_v3  ;;  %v163_v13 = vld [vmem:[%s1357_s1 + $0x3f8] sm:$0xff]  ;;  %v130_v16 = vld [vmem:[%s1357_s1 + $0x2f0] sm:$0xff] }
  0x17   :  { %761 = vmatpush3.msra.mxu1 %v74_v44  ;;  %727 = vmatprep.subr.mxu0 %v57_v45  ;;  %v36_v9 = vld [vmem:[%s1357_s1] sm:$0xff]  ;;  %v115_v14 = vld [vmem:[%s1357_s1 + $0x278] sm:$0xff]  ;;  %v162_v17 = vld [vmem:[%s1357_s1 + $0x3f0] sm:$0xff] }
  0x18   :  { %762 = vmatprep.subr.mxu1 %v89_v46  ;;  %728 = vmatpush3.msra.mxu0 %v41_v47  ;;  %v68_v10 = vld [vmem:[%s1357_s1 + $0x100] sm:$0xff]  ;;  %v147_v15 = vld [vmem:[%s1357_s1 + $0x378] sm:$0xff]  ;;  %v114_v18 = vld [vmem:[%s1357_s1 + $0x270] sm:$0xff] }
  0x19   :  { %763 = vmatpush3.msra.mxu1 %v73_v48  ;;  %729 = vmatprep.subr.mxu0 %v56_v49  ;;  %v146_v19 = vld [vmem:[%s1357_s1 + $0x370] sm:$0xff]  ;;  %v129_v20 = vld [vmem:[%s1357_s1 + $0x2e8] sm:$0xff]  ;;  %v128_v24 = vld [vmem:[%s1357_s1 + $0x2e0] sm:$0xff] }
  0x1a   :  { %764 = vmatprep.subr.mxu1 %v88_v50  ;;  %730 = vmatpush3.msra.mxu0 %v40_v52  ;;  %v161_v21 = vld [vmem:[%s1357_s1 + $0x3e8] sm:$0xff]  ;;  %v160_v25 = vld [vmem:[%s1357_s1 + $0x3e0] sm:$0xff]  ;;  %v127_v28 = vld [vmem:[%s1357_s1 + $0x2d8] sm:$0xff] }
  0x1b   :  { %765 = vmatpush3.msra.mxu1 %v72_v53  ;;  %731 = vmatprep.subr.mxu0 %v55_v55  ;;  %v113_v22 = vld [vmem:[%s1357_s1 + $0x268] sm:$0xff]  ;;  %v112_v26 = vld [vmem:[%s1357_s1 + $0x260] sm:$0xff]  ;;  %v159_v29 = vld [vmem:[%s1357_s1 + $0x3d8] sm:$0xff] }
  0x1c   :  { %766 = vmatprep.subr.mxu1 %v87_v56  ;;  %732 = vmatpush3.msra.mxu0 %v39_v58  ;;  %v145_v23 = vld [vmem:[%s1357_s1 + $0x368] sm:$0xff]  ;;  %v144_v27 = vld [vmem:[%s1357_s1 + $0x360] sm:$0xff]  ;;  %v111_v30 = vld [vmem:[%s1357_s1 + $0x258] sm:$0xff] }
  0x1d   :  { %767 = vmatpush3.msra.mxu1 %v71_v59  ;;  %733 = vmatprep.subr.mxu0 %v54_v60  ;;  %v143_v31 = vld [vmem:[%s1357_s1 + $0x358] sm:$0xff]  ;;  %v126_v32 = vld [vmem:[%s1357_s1 + $0x2d0] sm:$0xff]  ;;  %v125_v36 = vld [vmem:[%s1357_s1 + $0x2c8] sm:$0xff] }
  0x1e   :  { %768 = vmatprep.subr.mxu1 %v86_v61  ;;  %734 = vmatpush3.msra.mxu0 %v38_v63  ;;  %v158_v33 = vld [vmem:[%s1357_s1 + $0x3d0] sm:$0xff]  ;;  %v157_v37 = vld [vmem:[%s1357_s1 + $0x3c8] sm:$0xff]  ;;  %v124_v40 = vld [vmem:[%s1357_s1 + $0x2c0] sm:$0xff] }
  0x1f   :  { %769 = vmatpush3.msra.mxu1 %v70_v0  ;;  %735 = vmatprep.subr.mxu0 %v53_v1  ;;  %v110_v34 = vld [vmem:[%s1357_s1 + $0x250] sm:$0xff]  ;;  %v109_v38 = vld [vmem:[%s1357_s1 + $0x248] sm:$0xff]  ;;  %v156_v41 = vld [vmem:[%s1357_s1 + $0x3c0] sm:$0xff] }
  0x20   :  { %770 = vmatprep.subr.mxu1 %v85_v2  ;;  %736 = vmatpush3.msra.mxu0 %v37_v4  ;;  %v142_v35 = vld [vmem:[%s1357_s1 + $0x350] sm:$0xff]  ;;  %v141_v39 = vld [vmem:[%s1357_s1 + $0x348] sm:$0xff]  ;;  %v108_v42 = vld [vmem:[%s1357_s1 + $0x240] sm:$0xff] }
  0x21   :  { %771 = vmatpush3.msra.mxu1 %v69_v5  ;;  %737 = vmatprep.subr.mxu0 %v52_v6  ;;  %v140_v43 = vld [vmem:[%s1357_s1 + $0x340] sm:$0xff]  ;;  %v123_v44 = vld [vmem:[%s1357_s1 + $0x2b8] sm:$0xff]  ;;  %v122_v48 = vld [vmem:[%s1357_s1 + $0x2b0] sm:$0xff] }
  0x22   :  { %772 = vmatprep.subr.mxu1 %v84_v7  ;;  %738 = vmatpush3.msra.mxu0 %v36_v9  ;;  %v155_v45 = vld [vmem:[%s1357_s1 + $0x3b8] sm:$0xff]  ;;  %v154_v49 = vld [vmem:[%s1357_s1 + $0x3b0] sm:$0xff]  ;;  %v35_v53 = vld [vmem:[%s1358_s0 + $0x8] sm:$0xff] }
  0x23   :  { %279 = vmatprep.mubr.f32.mxu0 %v188_v8  ;;  %773 = vmatpush3.msra.mxu1 %v68_v10  ;;  %v107_v46 = vld [vmem:[%s1357_s1 + $0x238] sm:$0xff]  ;;  %v106_v50 = vld [vmem:[%s1357_s1 + $0x230] sm:$0xff]  ;;  %v121_v54 = vld [vmem:[%s1357_s1 + $0x2a8] sm:$0xff]  ;;  %v190_v60 = vcombine.high %v35_v53, %v35_v53  ;;  %v197_v5 = vrot.slane %v35_v53, %v1066_v51 }
  0x24   :  { %280 = vmatmul.mubr.f32.vlgmr.msra.gmra.mxu0 %v180_v62  ;;  %349 = vmatprep.mubr.f32.mxu1 %v189_v11  ;;  %v139_v47 = vld [vmem:[%s1357_s1 + $0x338] sm:$0xff]  ;;  %v138_v52 = vld [vmem:[%s1357_s1 + $0x330] sm:$0xff]  ;;  %v153_v55 = vld [vmem:[%s1357_s1 + $0x3a8] sm:$0xff] }
  0x25   :  { %777 = vmatprep.subr.mxu0 %v131_v12  ;;  %812 = vmatprep.subr.mxu1 %v163_v13  ;;  %v105_v56 = vld [vmem:[%s1357_s1 + $0x228] sm:$0xff]  ;;  %v120_v58 = vld [vmem:[%s1357_s1 + $0x2a0] sm:$0xff]  ;;  %v119_v63 = vld [vmem:[%s1357_s1 + $0x298] sm:$0xff]  ;;  %v204_v8 = vrot.slane %v190_v60, %v1066_v51 }
  0x26   :  { %350 = vmatmul.mubr.f32.vlgmr.msra.gmra.mxu1 %v187_v3  ;;  %778 = vmatpush3.msra.mxu0 %v115_v14  ;;  %v137_v57 = vld [vmem:[%s1357_s1 + $0x328] sm:$0xff]  ;;  %v152_v59 = vld [vmem:[%s1357_s1 + $0x3a0] sm:$0xff]  ;;  %v151_v0 = vld [vmem:[%s1357_s1 + $0x398] sm:$0xff]  ;;  %v205_v14 = vcombine.high %v197_v5, %v197_v5 }
  0x27   :  { %813 = vmatpush3.msra.mxu1 %v147_v15  ;;  %779 = vmatprep.subr.mxu0 %v130_v16  ;;  %v104_v61 = vld [vmem:[%s1357_s1 + $0x220] sm:$0xff]  ;;  %v103_v1 = vld [vmem:[%s1357_s1 + $0x218] sm:$0xff]  ;;  %v118_v3 = vld [vmem:[%s1357_s1 + $0x290] sm:$0xff]  ;;  %v206_v16 = vcombine.high %v204_v8, %v204_v8 }
  0x28   :  { %814 = vmatprep.subr.mxu1 %v162_v17  ;;  %780 = vmatpush3.msra.mxu0 %v114_v18  ;;  %v136_v62 = vld [vmem:[%s1357_s1 + $0x320] sm:$0xff]  ;;  %v135_v2 = vld [vmem:[%s1357_s1 + $0x318] sm:$0xff]  ;;  %v150_v4 = vld [vmem:[%s1357_s1 + $0x390] sm:$0xff]  ;;  %v876_v18 = vmov 0.0  }
  0x29   :  { %815 = vmatpush3.msra.mxu1 %v146_v19  ;;  %781 = vmatprep.subr.mxu0 %v129_v20  ;;  %v102_v6 = vld [vmem:[%s1357_s1 + $0x210] sm:$0xff]  ;;  %v117_v9 = vld [vmem:[%s1357_s1 + $0x288] sm:$0xff]  ;;  %v116_v12 = vld [vmem:[%s1357_s1 + $0x280] sm:$0xff] }
  0x2a   :  { %816 = vmatprep.subr.mxu1 %v161_v21  ;;  %782 = vmatpush3.msra.mxu0 %v113_v22  ;;  %v134_v7 = vld [vmem:[%s1357_s1 + $0x310] sm:$0xff]  ;;  %v149_v10 = vld [vmem:[%s1357_s1 + $0x388] sm:$0xff]  ;;  %v148_v13 = vld [vmem:[%s1357_s1 + $0x380] sm:$0xff] }
  0x2b   :  { %817 = vmatpush3.msra.mxu1 %v145_v23  ;;  %783 = vmatprep.subr.mxu0 %v128_v24  ;;  %v101_v11 = vld [vmem:[%s1357_s1 + $0x208] sm:$0xff]  ;;  %v100_v15 = vld [vmem:[%s1357_s1 + $0x200] sm:$0xff] }
  0x2c   :  { %818 = vmatprep.subr.mxu1 %v160_v25  ;;  %784 = vmatpush3.msra.mxu0 %v112_v26  ;;  %v133_v51 = vld [vmem:[%s1357_s1 + $0x308] sm:$0xff]  ;;  %v132_v17 = vld [vmem:[%s1357_s1 + $0x300] sm:$0xff] }
  0x2d   :  { %819 = vmatpush3.msra.mxu1 %v144_v27  ;;  %785 = vmatprep.subr.mxu0 %v127_v28  ;;  %v496_v19 = vld [vmem:[%s1359_s3 + $0x8] sm:$0x3f]  ;;  %v495_v20 = vld [vmem:[%s1359_s3] sm:$0xff] }
  0x2e   :  { %820 = vmatprep.subr.mxu1 %v159_v29  ;;  %786 = vmatpush3.msra.mxu0 %v111_v30  ;;  %v698_v25 = vld [vmem:[%s1360_s2] ss:$0 sm:$0xff] }
  0x2f   :  { %821 = vmatpush3.msra.mxu1 %v143_v31  ;;  %787 = vmatprep.subr.mxu0 %v126_v32 }
  0x30   :  { %822 = vmatprep.subr.mxu1 %v158_v33  ;;  %788 = vmatpush3.msra.mxu0 %v110_v34 }
  0x31   :  { %823 = vmatpush3.msra.mxu1 %v142_v35  ;;  %789 = vmatprep.subr.mxu0 %v125_v36 }
  0x32   :  { %824 = vmatprep.subr.mxu1 %v157_v37  ;;  %790 = vmatpush3.msra.mxu0 %v109_v38  ;;  %v585_v38 = vld [vmem:[%s1361_s5 + $0x10] sm:$0xf] }
  0x33   :  { %825 = vmatpush3.msra.mxu1 %v141_v39  ;;  %791 = vmatprep.subr.mxu0 %v124_v40  ;;  %v584_v39 = vld [vmem:[%s1361_s5 + $0x8] sm:$0xff]  ;;  %v583_v40 = vld [vmem:[%s1361_s5] sm:$0xff] }
  0x34   :  { %826 = vmatprep.subr.mxu1 %v156_v41  ;;  %792 = vmatpush3.msra.mxu0 %v108_v42  ;;  %v699_v41 = vld [vmem:[%s1362_s4] ss:$0 sm:$0xff] }
  0x35   :  { %827 = vmatpush3.msra.mxu1 %v140_v43  ;;  %793 = vmatprep.subr.mxu0 %v123_v44 }
  0x36   :  { %828 = vmatprep.subr.mxu1 %v155_v45  ;;  %794 = vmatpush3.msra.mxu0 %v107_v46  ;;  %v14_v46 = vstv %s1363_s8 }
  0x37   :  { %829 = vmatpush3.msra.mxu1 %v139_v47  ;;  %795 = vmatprep.subr.mxu0 %v122_v48  ;;  %15 = vst [vmem:[#allocation2] sm:$0x1] %v14_v46  ;;  %v702_v47 = vld [vmem:[%s1364_s6] ss:$0 sm:$0xff] }
  0x38   :  { %830 = vmatprep.subr.mxu1 %v154_v49  ;;  %796 = vmatpush3.msra.mxu0 %v106_v50 }
  0x39   :  { %831 = vmatpush3.msra.mxu1 %v138_v52  ;;  %797 = vmatprep.subr.mxu0 %v121_v54  ;;  %v705_v52 = vld [vmem:[%s1365_s7] ss:$0 sm:$0xff] }
  0x3a   :  { %832 = vmatprep.subr.mxu1 %v153_v55  ;;  %798 = vmatpush3.msra.mxu0 %v105_v56 }
  0x3b   :  { %833 = vmatpush3.msra.mxu1 %v137_v57  ;;  %799 = vmatprep.subr.mxu0 %v120_v58 }
  0x3c   :  { %834 = vmatprep.subr.mxu1 %v152_v59  ;;  %800 = vmatpush3.msra.mxu0 %v104_v61 }
  0x3d   :  { %835 = vmatpush3.msra.mxu1 %v136_v62  ;;  %801 = vmatprep.subr.mxu0 %v119_v63 }
  0x3e   :  { %836 = vmatprep.subr.mxu1 %v151_v0  ;;  %802 = vmatpush3.msra.mxu0 %v103_v1  ;;  %v706_v56 = vld [vmem:[#allocation2] ss:$0 sm:$0xff] }
  0x3f   :  { %837 = vmatpush3.msra.mxu1 %v135_v2  ;;  %803 = vmatprep.subr.mxu0 %v118_v3 }
  0x40   :  { %838 = vmatprep.subr.mxu1 %v150_v4  ;;  %804 = vmatpush3.msra.mxu0 %v102_v6 }
  0x41   :  { %839 = vmatpush3.msra.mxu1 %v134_v7  ;;  %805 = vmatprep.subr.mxu0 %v117_v9 }
  0x42   :  { %840 = vmatprep.subr.mxu1 %v149_v10  ;;  %806 = vmatpush3.msra.mxu0 %v101_v11 }
  0x43   :  { %841 = vmatpush3.msra.mxu1 %v133_v51  ;;  %807 = vmatprep.subr.mxu0 %v116_v12 }
  0x44   :  { %842 = vmatprep.subr.mxu1 %v148_v13  ;;  %808 = vmatpush3.msra.mxu0 %v100_v15 }
  0x45   :  { %419 = vmatprep.mubr.f32.mxu0 %v205_v14  ;;  %843 = vmatpush3.msra.mxu1 %v132_v17 }
  0x46   :  { %489 = vmatprep.mubr.f32.mxu1 %v206_v16  ;;  %420 = vmatmul.mubr.f32.vlgmr.msra.gmra.mxu0 %v197_v5 }
  0x47   :  { %490 = vmatmul.mubr.f32.vlgmr.msra.gmra.mxu1 %v204_v8  ;;  %854 = vmatprep.subr.mxu0 %v876_v18 }
  0x48   :  { %861 = vmatprep.subr.mxu1 %v876_v18  ;;  %855 = vmatpush3.msk.msra.mxu0 %vm508_vm0, %v496_v19 }
  0x49   :  { %856 = vmatprep.subr.mxu0 %v876_v18  ;;  %858 = vmatprep.mubr.msk.f32.mxu0 %vm877_vm1, %v876_v18 }
  0x4a   :  { %857 = vmatpush3.msra.mxu0 %v495_v20  ;;  %867 = vmatprep.mubr.msk.f32.mxu1 %vm877_vm1, %v876_v18 }
  0x4b   :  { %862 = vmatpush3.msk.msra.mxu1 %vm597_vm3, %v585_v38 }
  0x4c   :  { %863 = vmatprep.subr.mxu1 %v876_v18 }
  0x4d   :  { %864 = vmatpush3.msra.mxu1 %v584_v39 }
  0x4e   :  { %865 = vmatprep.subr.mxu1 %v876_v18 }
  0x4f   :  { %866 = vmatpush3.msra.mxu1 %v583_v40 }
  0xe4   :  { %v739_v21 = vpop.f32.mrf.mxu0 }
  0xe6   :  { %v774_v22 = vpop.f32.mrf.mxu1  ;;  %v740_v23 = vpop.f32.mrf.mxu0 }
  0xe7   :  { %v741_v24 = vadd.f32 %v740_v23, %v739_v21 }
  0xe8   :  { %v775_v26 = vpop.f32.mrf.mxu1 }
  0xe9   :  { %v282_v27 = vadd.f32 %v741_v24, %v698_v25  ;;  %v776_v28 = vadd.f32 %v775_v26, %v774_v22 }
  0xeb   :  { %v352_v33 = vadd.f32 %v776_v28, %v282_v27 }
 0x106   :  { %v809_v29 = vpop.f32.mrf.mxu0 }
 0x107   :  { %v844_v30 = vpop.f32.mrf.mxu1 }
 0x108   :  { %v810_v31 = vpop.f32.mrf.mxu0 }
 0x109   :  { %v845_v32 = vpop.f32.mrf.mxu1  ;;  %v811_v34 = vadd.f32 %v810_v31, %v809_v29 }
 0x10a   :  { %v846_v36 = vadd.f32 %v845_v32, %v844_v30 }
 0x10b   :  { %v422_v35 = vadd.f32 %v811_v34, %v352_v33 }
 0x10d   :  { %v492_v37 = vadd.f32 %v846_v36, %v422_v35 }
 0x10f   :  { %859 = vmatmul.mubr.msk.f32.vlgmr.msra.gmra.mxu0 %vm504_vm2, %v492_v37 }
 0x1cf   :  { %v578_v42 = vpop.f32.mrf.mxu0 }
 0x1d0   :  { %v579_v43 = vadd.f32 %v699_v41, %v578_v42 }
 0x1d1   :  { %v860_v44 = vpop.f32.mrf.mxu0 }
 0x1d2   :  { %v582_v45 = vmax.f32 %v579_v43, 0.0 }
 0x1d4   :  { %868 = vmatmul.mubr.msk.f32.vlgmr.msra.gmra.mxu1 %vm593_vm4, %v582_v45 }
 0x294   :  { %v667_v48 = vpop.f32.mrf.mxu1 }
 0x295   :  { %v668_v49 = vadd.f32 %v702_v47, %v667_v48 }
 0x296   :  { %v869_v50 = vpop.f32.mrf.mxu1 }
 0x297   :  { %v671_v53 = vmax.f32 %v668_v49, 0.0 }
 0x299   :  { %v679_v54 = vmul.f32 %v705_v52, %v671_v53 }
 0x29b   :  { %v681_v55 = vsel %vm680_vm5, %v679_v54, 0.0 }
 0x29c   :  { %682 = vadd.xlane.f32.xlu0 %v681_v55 }
 0x325   :  { %v683_v57 = vpop.xlane.xlu0 %682 }
 0x326   :  { %v691_v58 = vadd.f32 %v706_v56, %v683_v57 }
 0x328   :  { %693 = vst.msk [vmem:[%s1366_s9] sm:$0x3] %vm692_vm6, %v691_v58 }

</bundles_post_ra>
